<compile_context>
chip_gen: v6e
topology: v6e:2x2x1
jax: 0.10.0
libtpu: 0.0.40
codegen_flags: <defaults>
</compile_context>

<pallas_src>
import jax
import jax.numpy as jnp
from jax.experimental import pallas as pl
from jax.experimental.pallas import tpu as pltpu


_TARGET_BLOCK_BYTES = 2 * 1024 * 1024     # ~2 MiB block -> 8 MiB VMEM w/ dbl buffering
_MIN_PARALLEL_BLOCK_BYTES = 512 * 1024    # floor when splitting for >=8 grid steps
_LANE_CANDIDATES = (4096, 2048, 1024, 512, 256)  # lane-dense widths (multiples of 128)


def _siren_kernel(x_ref, o_ref):
    # Elementwise sin on the current (block_rows, width) VMEM tile.
    o_ref[...] = jnp.sin(x_ref[...].astype(jnp.float32)).astype(o_ref.dtype)


def _min_sublane_rows(dtype) -> int:
    # Minimum second-to-last tile dim per dtype packing (f32:8, bf16:16, int8/fp8:32).
    itemsize = jnp.dtype(dtype).itemsize
    return {4: 8, 2: 16, 1: 32}.get(itemsize, 8)


def _choose_width(n: int, min_rows: int) -> int:
    # Prefer the widest lane-dense width that still yields >= min_rows rows.
    for cand in _LANE_CANDIDATES:
        if n % cand == 0 and n // cand >= min_rows:
            return cand
    for cand in _LANE_CANDIDATES:
        if n % cand == 0:
            return cand
    return 128


@jax.jit
def _siren_2d(x2d):
    rows, width = x2d.shape
    itemsize = jnp.dtype(x2d.dtype).itemsize
    min_rows = _min_sublane_rows(x2d.dtype)

    # ~2 MiB worth of rows, rounded down to the sublane tile.
    target_rows = max(
        min_rows,
        (_TARGET_BLOCK_BYTES // (width * itemsize)) // min_rows * min_rows,
    )

    # Encourage >= 8 grid steps on large inputs (v7x megacore sharding) as long
    # as blocks stay >= ~512 KiB.
    floor_rows = max(
        min_rows,
        (_MIN_PARALLEL_BLOCK_BYTES // (width * itemsize)) // min_rows * min_rows,
    )
    if rows >= 8 * floor_rows:
        target_rows = min(
            target_rows, max(floor_rows, (rows // 8) // min_rows * min_rows)
        )

    if target_rows >= rows:
        block_rows = rows          # single full-array block (total <= ~2 MiB)
    else:
        block_rows = target_rows   # multiple of min_rows; last block may be partial

    grid = (pl.cdiv(rows, block_rows),)

    return pl.pallas_call(
        _siren_kernel,
        out_shape=jax.ShapeDtypeStruct((rows, width), x2d.dtype),
        grid_spec=pltpu.PrefetchScalarGridSpec(
            num_scalar_prefetch=0,
            grid=grid,
            in_specs=[pl.BlockSpec((block_rows, width), lambda i: (i, 0))],
            out_specs=pl.BlockSpec((block_rows, width), lambda i: (i, 0)),
        ),
        compiler_params=pltpu.CompilerParams(
            dimension_semantics=("parallel",),
        ),
        input_output_aliases={0: 0},
    )(x2d)


def siren_pallas(x: jax.Array) -> jax.Array:
    """Applies sin(x) elementwise via a Pallas TPU kernel (== torch.sin)."""
    if x.size == 0:
        return x

    orig_shape = x.shape
    n = x.size
    min_rows = _min_sublane_rows(x.dtype)
    width = _choose_width(n, min_rows)

    if n % width == 0:
        # Common case: pure reshape in, pure reshape out — no extra HBM copies.
        out2d = _siren_2d(x.reshape(n // width, width))
        return out2d.reshape(orig_shape)

    # Rare ragged case (n not a multiple of 128): minimal pad to one sublane
    # tile, compute, slice the valid prefix back.
    tile = min_rows * width
    padded_n = ((n + tile - 1) // tile) * tile
    flat = jnp.pad(x.reshape(-1), (0, padded_n - n))
    out2d = _siren_2d(flat.reshape(padded_n // width, width))
    return out2d.reshape(-1)[:n].reshape(orig_shape)


if __name__ == "__main__":
    key = jax.random.PRNGKey(0)
    # Small NCHW-like input, consistent with how Siren is applied to conv
    # feature maps in the keypoint network.
    x = jax.random.normal(key, (2, 4, 16, 16), dtype=jnp.float32)

    y = siren_pallas(x)
    y = jax.block_until_ready(y)

    # Correctness check against the plain-JAX reference (== torch.sin).
    y_ref = jnp.sin(x)
    assert y.shape == x.shape and y.dtype == x.dtype
    assert jnp.allclose(y, y_ref, atol=1e-6, rtol=1e-6)

    # Also exercise a non-power-of-two / ragged shape to cover the cdiv path.
    x2 = jax.random.normal(jax.random.PRNGKey(1), (3, 5, 7), dtype=jnp.float32)
    y2 = jax.block_until_ready(siren_pallas(x2))
    assert jnp.allclose(y2, jnp.sin(x2), atol=1e-6, rtol=1e-6)

    print("KERNEL_OK")
</pallas_src>

<mosaic_0001>
module attributes {stable_mosaic.version = 11 : i64} {
  func.func @_siren_kernel(%arg0: i32, %arg1: memref<8x256xf32, #tpu.memory_space<vmem>>, %arg2: memref<8x256xf32, #tpu.memory_space<vmem>>) attributes {dimension_semantics = [#tpu.dimension_semantics<parallel>], iteration_bounds = array<i64: 1>, scalar_prefetch = 0 : i64, scratch_operands = 0 : i64, tpu.core_type = #tpu.core_type<tc>, window_params = [{transform_indices = @transform_0, window_bounds = array<i64: 8, 256>}, {transform_indices = @transform_1, window_bounds = array<i64: 8, 256>}]} {
    %c0 = arith.constant 0 : index
    %c0_0 = arith.constant 0 : index
    %0 = vector.load %arg1[%c0, %c0_0] : memref<8x256xf32, #tpu.memory_space<vmem>>, vector<8x256xf32>
    %1 = math.sin %0 : vector<8x256xf32>
    %c0_1 = arith.constant 0 : index
    %c0_2 = arith.constant 0 : index
    %2 = vector.load %arg2[%c0_1, %c0_2] : memref<8x256xf32, #tpu.memory_space<vmem>>, vector<8x256xf32>
    tpu.vector_store %arg2[%c0_1, %c0_2], %1 {strides = array<i32>} : memref<8x256xf32, #tpu.memory_space<vmem>>, vector<8x256xf32>,
    return
  }
  func.func @transform_0(%arg0: i32) -> (i32, i32) {
    %c0_i32 = arith.constant 0 : i32
    %c0_i32_0 = arith.constant 0 : i32
    return %arg0, %c0_i32 : i32, i32
  }
  func.func @transform_1(%arg0: i32) -> (i32, i32) {
    %c0_i32 = arith.constant 0 : i32
    %c0_i32_0 = arith.constant 0 : i32
    return %arg0, %c0_i32 : i32, i32
  }
}

</mosaic_0001>

<bundles_post_ra>
// kernel: _siren_2d.1
= control target key start
LH: loop header
LB: loop body
LE: loop exit
PB: predicated region body
PF: predicated region fallthrough
CT: control target
= control target key end

     0   :  { %6 = vsyncpa [#allocation3], 0  ;;  %s426_s0 = inlined_call_operand.hbm [shape: f32[8,256], index: 0, kind: input, shape index: {}, may-alias: {0,1}]   ;;  %s427_s1 = inlined_call_operand.hbm [shape: f32[8,256], index: 1, kind: output, shape index: {}, may-alias: {0,1}]  }
   0x1   :  { %7 = vsyncpa [#allocation4], 0  ;;  %s324_s6 = smov [#allocation2]  }
   0x2   :  { %s14_s7 = sshll.u32 %s324_s6, 4  ;;  %s15_s7 = int_to_ptr.vmem [resolvable:$true] %s14_s7 }
   0x3   :  { %s288_s8 = scalar_lea.vmem %s15_s7, 256  ;;  %p293_p1 = scmp.lt.s32.totalorder %s15_s7, %s15_s7 }
   0x4   :  { %p289_p0 = scmp.ne.s32.totalorder %s15_s7, %s288_s8  ;;  %p294_p2 = scmp.lt.s32.totalorder %s288_s8, %s288_s8 }
   0x6   :  { %p295_p3 = por %p294_p2, %p293_p1 }
   0x8   :  { %p296_p4 = pnand %p295_p3, %p289_p0 }
   0xa   :  { %299 = shalt.err (!%p296_p4)
}
   0xb   :  { %17 = dma.hbm_to_vmem [thread:$0]  %s426_s0, 256, %s15_s7, [#allocation3]  }
   0xc   :  { %320 = dma.done.wait [#allocation3], 256  }
   0xd   :  { %321 = vsyncadd [#allocation3], 4294967040  ;;  %v345_v0 = vld [vmem:[#allocation2] sm:$0xff]  ;;  %v347_v1 = vld [vmem:[#allocation2 + $0x8] sm:$0xff]  ;;  %v325_v24 = vmov 683565275  }
   0xe   :  { %v23_v2 = vand.u32 2147483647, %v345_v0  ;;  %v26_v3 = vand.u32 2139095040, %v345_v0  ;;  %v127_v4 = vand.u32 2147483647, %v347_v1  ;;  %v130_v5 = vand.u32 2139095040, %v347_v1 }
   0xf   :  { %v326_v26 = vmov 2475754826   ;;  %v327_v28 = vmov 2131351028   ;;  %v328_v30 = vmov 2102212464  }
  0x10   :  { %v27_v6 = vshrl.u32 %v26_v3, 23  ;;  %v30_v7 = vand.u32 8388607, %v23_v2  ;;  %v131_v8 = vshrl.u32 %v130_v5, 23  ;;  %v134_v9 = vand.u32 8388607, %v127_v4 }
  0x11   :  { %v329_v32 = vmov 920167782   ;;  %v330_v40 = vmov 1326507024   ;;  %vm25_vm14 = vcmp.lt.s32.totalorder %v345_v0, 0  ;;  %s331_s0 = smov [#allocation5]  }
  0x12   :  { %v248_v10 = vadd.s32 4294967169, %v27_v6  ;;  %v252_v11 = vadd.s32 4294967169, %v131_v8  ;;  %v31_v13 = vor.u32 8388608, %v30_v7  ;;  %v135_v14 = vor.u32 8388608, %v134_v9  ;;  %s239_s11 = sshll.u32 %s331_s0, 4  ;;  %s240_s11 = int_to_ptr.vmem [resolvable:$true] %s239_s11 }
  0x13   :  { %vm408_vm15 = vcmp.le.f32.partialorder %v23_v2, 0.7853982  ;;  %s300_s12 = scalar_lea.vmem %s240_s11, 256  ;;  %p305_p6 = scmp.lt.s32.totalorder %s240_s11, %s240_s11 }
  0x14   :  { %v33_v12 = vadd.s32 1, %v248_v10  ;;  %v137_v15 = vadd.s32 1, %v252_v11  ;;  %v357_v20 = vshll.u32 %v31_v13, 8  ;;  %v359_v22 = vshll.u32 %v135_v14, 8  ;;  %p301_p5 = scmp.ne.s32.totalorder %s240_s11, %s300_s12  ;;  %p306_p7 = scmp.lt.s32.totalorder %s300_s12, %s300_s12 }
  0x16   :  { %vm34_vm0 = vcmp.gt.s32.totalorder %v33_v12, 0  ;;  %vm138_vm1 = vcmp.gt.s32.totalorder %v137_v15, 0  ;;  %p307_p8 = por %p306_p7, %p305_p6 }
  0x17   :  { %v35_v16 = vsel %vm34_vm0, %v33_v12, 0  ;;  %v139_v19 = vsel %vm138_vm1, %v137_v15, 0  ;;  %vm129_vm0 = vcmp.lt.s32.totalorder %v347_v1, 0  ;;  %vm128_vm1 = vcmp.le.f32.partialorder %v127_v4, 0.7853982 }
  0x18   :  { %v36_v17 = vshrl.u32 %v35_v16, 5  ;;  %v37_v18 = vand.u32 31, %v35_v16  ;;  %v141_v21 = vand.u32 31, %v139_v19  ;;  %v361_v34 = vshrl.u32 %v139_v19, 5  ;;  %p308_p9 = pnand %p307_p8, %p301_p5 }
  0x1a   :  { %v38_v23 = vsub.s32 32, %v37_v18  ;;  %v40_v25 = vshll.u32 %v325_v24, %v37_v18  ;;  %v43_v27 = vshll.u32 %v326_v26, %v37_v18  ;;  %v46_v29 = vshll.u32 %v327_v28, %v37_v18 }
  0x1b   :  { %v49_v31 = vshll.u32 %v328_v30, %v37_v18  ;;  %v52_v33 = vshll.u32 %v329_v32, %v37_v18  ;;  %vm55_vm2 = vcmp.lt.s32.totalorder %v36_v17, 1  ;;  %vm56_vm3 = vcmp.lt.s32.totalorder %v36_v17, 2 }
  0x1c   :  { %v39_v35 = vshrl.u32 %v325_v24, %v38_v23  ;;  %v41_v36 = vshrl.u32 %v326_v26, %v38_v23  ;;  %v44_v37 = vshrl.u32 %v327_v28, %v38_v23  ;;  %v47_v38 = vshrl.u32 %v328_v30, %v38_v23 }
  0x1d   :  { %v50_v39 = vshrl.u32 %v329_v32, %v38_v23  ;;  %v53_v41 = vshrl.u32 %v330_v40, %v38_v23  ;;  %vm58_vm4 = vcmp.lt.s32.totalorder %v36_v17, 4  ;;  %v142_v45 = vsub.s32 32, %v141_v21 }
  0x1e   :  { %v42_v42 = vor.u32 %v41_v36, %v40_v25  ;;  %v45_v43 = vor.u32 %v44_v37, %v43_v27  ;;  %v48_v44 = vor.u32 %v47_v38, %v46_v29  ;;  %vm57_vm5 = vcmp.lt.s32.totalorder %v36_v17, 3 }
  0x1f   :  { %v51_v46 = vor.u32 %v50_v39, %v49_v31  ;;  %v54_v47 = vor.u32 %v53_v41, %v52_v33  ;;  %v144_v48 = vshll.u32 %v325_v24, %v141_v21  ;;  %v147_v56 = vshll.u32 %v326_v26, %v141_v21 }
  0x20   :  { %v59_v49 = vsel %vm55_vm2, %v39_v35, %v42_v42  ;;  %v60_v50 = vsel %vm58_vm4, %v48_v44, 2102212464  ;;  %v63_v51 = vsel %vm55_vm2, %v42_v42, %v45_v43  ;;  %v67_v52 = vsel %vm55_vm2, %v45_v43, %v48_v44 }
  0x21   :  { %v61_v53 = vsel %vm57_vm5, %v45_v43, %v60_v50  ;;  %v64_v54 = vsel %vm58_vm4, %v51_v46, 920167782  ;;  %v68_v55 = vsel %vm58_vm4, %v54_v47, 1326507024  ;;  %v143_v59 = vshrl.u32 %v325_v24, %v142_v45 }
  0x22   :  { %v65_v57 = vsel %vm57_vm5, %v48_v44, %v64_v54  ;;  %v69_v58 = vsel %vm57_vm5, %v51_v46, %v68_v55  ;;  %v145_v60 = vshrl.u32 %v326_v26, %v142_v45  ;;  %v62_v61 = vsel %vm56_vm3, %v59_v49, %v61_v53 }
  0x23   :  { %v66_v62 = vsel %vm56_vm3, %v63_v51, %v65_v57  ;;  %v70_v63 = vsel %vm56_vm3, %v67_v52, %v69_v58  ;;  %v148_v3 = vshrl.u32 %v327_v28, %v142_v45  ;;  %v150_v11 = vshll.u32 %v327_v28, %v141_v21 }
  0x24   :  { %v370_v5 = vmul.u32.u64.low %v357_v20, %v70_v63  ;;  %v371_v6 = vmul.u32.u64.high %v357_v20, %v70_v63, %v370_v5  ;;  %v374_v7 = vmul.u32.u64.low %v357_v20, %v66_v62  ;;  %v375_v8 = vmul.u32.u64.high %v357_v20, %v66_v62, %v374_v7 }
  0x25   :  { %v146_v9 = vor.u32 %v145_v60, %v144_v48  ;;  %v149_v10 = vor.u32 %v148_v3, %v147_v56  ;;  %v151_v12 = vshrl.u32 %v328_v30, %v142_v45  ;;  %v153_v13 = vshll.u32 %v328_v30, %v141_v21 }
  0x26   :  { %v154_v14 = vshrl.u32 %v329_v32, %v142_v45  ;;  %v156_v15 = vshll.u32 %v329_v32, %v141_v21  ;;  %v157_v16 = vshrl.u32 %v330_v40, %v142_v45  ;;  %v78_v17 = vmul.u32 %v357_v20, %v62_v61 }
  0x27   :  { %v152_v18 = vor.u32 %v151_v12, %v150_v11  ;;  %vm159_vm6 = vcmp.lt.s32.totalorder %v361_v34, 1  ;;  %vm160_vm7 = vcmp.lt.s32.totalorder %v361_v34, 2  ;;  %vm80_vm8 = vc.u32 %v371_v6, %v374_v7 }
  0x28   :  { %v81_v19 = vadd.s32 1, %v375_v8  ;;  %v155_v23 = vor.u32 %v154_v14, %v153_v13  ;;  %vm161_vm9 = vcmp.lt.s32.totalorder %v361_v34, 3  ;;  %v158_v24 = vor.u32 %v157_v16, %v156_v15 }
  0x29   :  { %vm162_vm10 = vcmp.lt.s32.totalorder %v361_v34, 4  ;;  %v163_v25 = vsel %vm159_vm6, %v143_v59, %v146_v9  ;;  %v167_v21 = vsel %vm159_vm6, %v146_v9, %v149_v10  ;;  %v171_v28 = vsel %vm159_vm6, %v149_v10, %v152_v18 }
  0x2a   :  { %v82_v26 = vsel %vm80_vm8, %v81_v19, %v375_v8  ;;  %v164_v20 = vsel %vm162_vm10, %v152_v18, 2102212464  ;;  %v168_v27 = vsel %vm162_vm10, %v155_v23, 920167782  ;;  %v172_v32 = vsel %vm162_vm10, %v158_v24, 1326507024 }
  0x2b   :  { %v83_v29 = vadd.s32 %v82_v26, %v78_v17  ;;  %v165_v30 = vsel %vm161_vm9, %v149_v10, %v164_v20  ;;  %v169_v31 = vsel %vm161_vm9, %v152_v18, %v168_v27  ;;  %v173_v36 = vsel %vm161_vm9, %v155_v23, %v172_v32 }
  0x2c   :  { %v166_v33 = vsel %vm160_vm7, %v163_v25, %v165_v30  ;;  %v170_v35 = vsel %vm160_vm7, %v167_v21, %v169_v31  ;;  %v174_v38 = vsel %vm160_vm7, %v171_v28, %v173_v36  ;;  %v79_v57 = vadd.s32 %v374_v7, %v371_v6 }
  0x2d   :  { %v84_v37 = vadd.s32 536870912, %v83_v29  ;;  %v392_v39 = vmul.u32.u64.low %v359_v22, %v170_v35  ;;  %v393_v40 = vmul.u32.u64.high %v359_v22, %v170_v35, %v392_v39  ;;  %v182_v44 = vmul.u32 %v359_v22, %v166_v33 }
  0x2e   :  { %v396_v41 = vmul.u32.u64.low %v359_v22, %v174_v38  ;;  %v397_v42 = vmul.u32.u64.high %v359_v22, %v174_v38, %v396_v41  ;;  %vm115_vm5 = vweird.f32 %v345_v0  ;;  %vm219_vm9 = vweird.f32 %v347_v1 }
  0x2f   :  { %v85_v43 = vshrl.u32 %v84_v37, 30  ;;  %v185_v46 = vadd.s32 1, %v393_v40 }
  0x30   :  { %vm184_vm11 = vc.u32 %v397_v42, %v392_v39  ;;  %v183_v13 = vadd.s32 %v392_v39, %v397_v42 }
  0x31   :  { %v86_v45 = vshll.u32 %v85_v43, 30  ;;  %v186_v34 = vsel %vm184_vm11, %v185_v46, %v393_v40  ;;  %v109_v18 = vsub.s32 4, %v85_v43 }
  0x32   :  { %v187_v48 = vadd.s32 %v186_v34, %v182_v44 }
  0x33   :  { %v87_v47 = vsub.s32 %v83_v29, %v86_v45  ;;  %v110_v27 = vsel %vm25_vm14, %v109_v18, %v85_v43 }
  0x34   :  { %v188_v50 = vadd.s32 536870912, %v187_v48  ;;  %v112_v2 = vsel %vm408_vm15, 0, %v110_v27 }
  0x35   :  { %v89_v49 = vsub.s32 0, %v87_v47  ;;  %v116_v35 = vadd.s32 3, %v112_v2 }
  0x36   :  { %v189_v52 = vshrl.u32 %v188_v50, 30 }
  0x37   :  { %v249_v51 = vmin.u32 %v89_v49, %v87_v47  ;;  %v117_v40 = vand.u32 3, %v116_v35 }
  0x38   :  { %v190_v54 = vshll.u32 %v189_v52, 30  ;;  %v213_v33 = vsub.s32 4, %v189_v52 }
  0x39   :  { %v91_v53 = vclz %v249_v51  ;;  %vm122_vm2 = vcmp.eq.s32.totalorder %v117_v40, 2  ;;  %vm119_vm3 = vcmp.eq.s32.totalorder %v117_v40, 0  ;;  %vm118_vm4 = vcmp.lt.s32.totalorder %v117_v40, 2 }
  0x3a   :  { %v191_v56 = vsub.s32 %v187_v48, %v190_v54  ;;  %v214_v38 = vsel %vm129_vm0, %v213_v33, %v189_v52 }
  0x3b   :  { %v250_v55 = vadd.s32 4294967294, %v91_v53  ;;  %v216_v41 = vsel %vm128_vm1, 0, %v214_v38 }
  0x3c   :  { %v193_v58 = vsub.s32 0, %v191_v56  ;;  %v220_v45 = vadd.s32 3, %v216_v41 }
  0x3d   :  { %vm251_vm12 = vcmp.lt.s32.totalorder %v250_v55, 0 }
  0x3e   :  { %v94_v22 = vsel %vm251_vm12, 0, %v250_v55  ;;  %v253_v62 = vmin.u32 %v193_v58, %v191_v56  ;;  %v221_v48 = vand.u32 3, %v220_v45 }
  0x3f   :  { %v95_v59 = vsub.s32 32, %v94_v22  ;;  %v96_v60 = vshll.u32 %v87_v47, %v94_v22  ;;  %v99_v61 = vsub.s32 4294967266, %v94_v22 }
  0x40   :  { %v195_v5 = vclz %v253_v62  ;;  %vm226_vm6 = vcmp.eq.s32.totalorder %v221_v48, 2  ;;  %vm223_vm7 = vcmp.eq.s32.totalorder %v221_v48, 0  ;;  %vm222_vm8 = vcmp.lt.s32.totalorder %v221_v48, 2 }
  0x41   :  { %v97_v63 = vshrl.u32 %v79_v57, %v95_v59  ;;  %v100_v3 = vadd.s32 127, %v99_v61 }
  0x42   :  { %v254_v10 = vadd.s32 4294967294, %v195_v5 }
  0x43   :  { %v98_v8 = vor.u32 %v97_v63, %v96_v60  ;;  %v101_v9 = vshll.u32 %v100_v3, 23 }
  0x44   :  { %vm255_vm13 = vcmp.lt.s32.totalorder %v254_v10, 0 }
  0x45   :  { %v102_v11 = vor.u32 4788187, %v101_v9  ;;  %v105_v12 = vcvt.s32.f32 %v98_v8  ;;  %v198_v6 = vsel %vm255_vm13, 0, %v254_v10 }
  0x46   :  { %v199_v7 = vsub.s32 32, %v198_v6  ;;  %v200_v15 = vshll.u32 %v191_v56, %v198_v6  ;;  %v203_v16 = vsub.s32 4294967266, %v198_v6 }
  0x47   :  { %v103_v14 = vand.u32 2147483647, %v102_v11 }
  0x48   :  { %v201_v19 = vshrl.u32 %v183_v13, %v199_v7  ;;  %v204_v23 = vadd.s32 127, %v203_v16 }
  0x49   :  { %v106_v17 = vmul.f32 %v105_v12, %v103_v14 }
  0x4a   :  { %v202_v21 = vor.u32 %v201_v19, %v200_v15  ;;  %v205_v26 = vshll.u32 %v204_v23, 23 }
  0x4b   :  { %v107_v25 = vxor.u32 2147483648, %v106_v17 }
  0x4c   :  { %v206_v29 = vor.u32 4788187, %v205_v26  ;;  %v209_v30 = vcvt.s32.f32 %v202_v21 }
  0x4d   :  { %v108_v20 = vsel %vm25_vm14, %v107_v25, %v106_v17 }
  0x4e   :  { %v111_v28 = vsel %vm408_vm15, %v345_v0, %v108_v20  ;;  %v207_v31 = vand.u32 2147483647, %v206_v29 }
  0x4f   :  { %272 = vcosq.f32 %v111_v28 }
  0x50   :  { %274 = vsinq.f32 %v111_v28  ;;  %v210_v32 = vmul.f32 %v209_v30, %v207_v31 }
  0x52   :  { %v211_v36 = vxor.u32 2147483648, %v210_v32 }
  0x54   :  { %v212_v37 = vsel %vm129_vm0, %v211_v36, %v210_v32 }
  0x55   :  { %v215_v39 = vsel %vm128_vm1, %v347_v1, %v212_v37 }
  0x56   :  { %276 = vcosq.f32 %v215_v39 }
  0x57   :  { %278 = vsinq.f32 %v215_v39 }
  0x5c   :  { %v273_v42 = vpop.eup %272 }
  0x5d   :  { %v275_v43 = vpop.eup %274  ;;  %v123_v44 = vxor.u32 2147483648, %v273_v42 }
  0x5e   :  { %v120_v46 = vxor.u32 2147483648, %v275_v43 }
  0x5f   :  { %v124_v4 = vsel %vm122_vm2, %v123_v44, %v275_v43 }
  0x60   :  { %v121_v47 = vsel %vm119_vm3, %v273_v42, %v120_v46 }
  0x61   :  { %v125_v34 = vsel %vm118_vm4, %v121_v47, %v124_v4 }
  0x62   :  { %v126_v49 = vsel %vm115_vm5, nan, %v125_v34 }
  0x63   :  { %231 = vst [vmem:[#allocation5] sm:$0xff] %v126_v49  ;;  %v277_v50 = vpop.eup %276 }
  0x64   :  { %v279_v51 = vpop.eup %278  ;;  %v227_v52 = vxor.u32 2147483648, %v277_v50 }
  0x65   :  { %v224_v53 = vxor.u32 2147483648, %v279_v51 }
  0x66   :  { %v228_v54 = vsel %vm226_vm6, %v227_v52, %v279_v51 }
  0x67   :  { %v225_v55 = vsel %vm223_vm7, %v277_v50, %v224_v53 }
  0x68   :  { %v229_v0 = vsel %vm222_vm8, %v225_v55, %v228_v54 }
  0x69   :  { %v230_v56 = vsel %vm219_vm9, nan, %v229_v0 }
  0x6a   :  { %232 = vst [vmem:[#allocation5 + $0x8] sm:$0xff] %v230_v56 }
  0x6b   :  { %311 = shalt.err (!%p308_p9)
}
  0x6c   :  { %242 = dma.vmem_to_hbm [thread:$0]  %s240_s11, 256, %s427_s1, [#allocation4]  }
  0x6d   :  { %322 = dma.done.wait [#allocation4], 256  }
  0x6e   :  { %323 = vsyncadd [#allocation4], 4294967040 }
  0x6f   :  { %246 = vsyncpa [#allocation3], 1 }
  0x70   :  { %247 = vsyncpa [#allocation4], 1 }

</bundles_post_ra>
